<compile_context>
chip_gen: v6e
topology: v6e:2x2x1
jax: 0.10.0
libtpu: 0.0.40
codegen_flags: <defaults>
</compile_context>

<pallas_src>
import math

import jax
import jax.numpy as jnp
from jax.experimental import pallas as pl
from jax.experimental.pallas import tpu as pltpu

SUBLANE = 8


# ---------------------------------------------------------------------------
# Pallas kernel: one batch tile of the MLP hot path (all f32).
# Refs: x (tb, S); W1 (S, H1); b1 (1, H1); W2 (H1, H2); b2 (1, H2);
#       W3 (H2, A); b3 (1, A); means (tb, A).
# ---------------------------------------------------------------------------
def cts_policy_kernel(x_ref, w1_ref, b1_ref, w2_ref, b2_ref, w3_ref, b3_ref,
                      means_ref):
    # Layer 1.
    h = jnp.tanh(
        jnp.dot(x_ref[...], w1_ref[...], preferred_element_type=jnp.float32)
        + b1_ref[...])                                                # (tb, H1)
    # Layer 2.
    h = jnp.tanh(
        jnp.dot(h, w2_ref[...], preferred_element_type=jnp.float32)
        + b2_ref[...])                                                # (tb, H2)
    # Final mean head: stored directly at natural width A.
    means_ref[...] = (
        jnp.dot(h, w3_ref[...], preferred_element_type=jnp.float32)
        + b3_ref[...])                                                # (tb, A)


# ---------------------------------------------------------------------------
# Wrapper: stream batch tiles, keep the tiny weights VMEM-resident.
# ---------------------------------------------------------------------------
def cts_policy_forward(x, params, *, block_b=2048):
    """CtsPolicy forward. `params` are natural (unpadded) f32 shapes:
       (W1(S,H1), b1(H1,), W2(H1,H2), b2(H2,), W3(H2,A), b3(A,), log_stdev(A,))."""
    w1, b1, w2, b2, w3, b3, log_stdev = params
    B, S = x.shape
    H1 = w1.shape[1]
    H2 = w2.shape[1]
    A = w3.shape[1]

    assert block_b % SUBLANE == 0
    if B <= block_b:
        tb = B                      # single tile: block == full batch dim (legal)
    else:
        tb = block_b                # multiple of 8; last grid step may be partial
    grid = (pl.cdiv(B, tb),)

    # Biases as (1, H) rows so they broadcast over the batch tile.
    b1_2d = b1[None, :]
    b2_2d = b2[None, :]
    b3_2d = b3[None, :]

    def resident(shape):            # stays in VMEM across all grid steps
        return pl.BlockSpec(shape, lambda i: (0, 0))

    cost = pl.CostEstimate(
        flops=2 * B * (S * H1 + H1 * H2 + H2 * A),
        transcendentals=B * (H1 + H2),
        bytes_accessed=4 * (B * S + B * A
                            + S * H1 + H1 * H2 + H2 * A + H1 + H2 + A),
    )

    means = pl.pallas_call(
        cts_policy_kernel,
        out_shape=jax.ShapeDtypeStruct((B, A), jnp.float32),
        grid=grid,
        in_specs=[
            pl.BlockSpec((tb, S), lambda i: (i, 0)),   # x: streamed per batch tile
            resident(w1.shape), resident(b1_2d.shape),
            resident(w2.shape), resident(b2_2d.shape),
            resident(w3.shape), resident(b3_2d.shape),
        ],
        out_specs=pl.BlockSpec((tb, A), lambda i: (i, 0)),
        compiler_params=pltpu.CompilerParams(
            dimension_semantics=("parallel",),          # megacore-shard batch tiles
        ),
        cost_estimate=cost,
    )(x, w1, b1_2d, w2, b2_2d, w3, b3_2d)

    # std changes only at parameter-update time; computed outside the kernel.
    std = jnp.exp(log_stdev)                            # (A,)
    return means, std


# ---------------------------------------------------------------------------
# Deterministic parameter init (xavier-uniform weights, zero biases,
# log_stdev = zeros) - mirrors initialize_weights(mod, 'xavier').
# ---------------------------------------------------------------------------
def xavier_uniform(key, fan_in, fan_out):
    bound = math.sqrt(6.0 / (fan_in + fan_out))
    return jax.random.uniform(key, (fan_in, fan_out), jnp.float32,
                              minval=-bound, maxval=bound)


def init_cts_policy_params(key, state_dim, action_dim, hidden_sizes=(64, 64)):
    keys = jax.random.split(key, len(hidden_sizes) + 1)
    params = []
    prev = state_dim
    for i, h in enumerate(hidden_sizes):
        params.append(xavier_uniform(keys[i], prev, h))
        params.append(jnp.zeros((h,), jnp.float32))
        prev = h
    params.append(xavier_uniform(keys[-1], prev, action_dim))
    params.append(jnp.zeros((action_dim,), jnp.float32))
    params.append(jnp.zeros((action_dim,), jnp.float32))   # log_stdev
    return tuple(params)


# ---------------------------------------------------------------------------
# Pure-JAX f32 reference for a sanity check.
# ---------------------------------------------------------------------------
def reference_forward(x, params):
    w1, b1, w2, b2, w3, b3, log_stdev = params
    h = jnp.tanh(x @ w1 + b1)
    h = jnp.tanh(h @ w2 + b2)
    means = h @ w3 + b3
    std = jnp.exp(log_stdev)
    return means, std


if __name__ == "__main__":
    STATE_DIM = 16
    ACTION_DIM = 8
    BATCH = 37          # deliberately not a multiple of 8

    key = jax.random.PRNGKey(0)
    k_x, k_p = jax.random.split(key)

    x = jax.random.normal(k_x, (BATCH, STATE_DIM), jnp.float32)
    params = init_cts_policy_params(k_p, STATE_DIM, ACTION_DIM)

    means, std = cts_policy_forward(x, params)
    jax.block_until_ready((means, std))

    ref_means, ref_std = reference_forward(x, params)
    assert means.shape == (BATCH, ACTION_DIM)
    assert std.shape == (ACTION_DIM,)
    # Full f32 path -> tight tolerance vs the f32 reference.
    assert jnp.allclose(means, ref_means, atol=1e-3, rtol=1e-3), (
        float(jnp.max(jnp.abs(means - ref_means))))
    assert jnp.allclose(std, ref_std, atol=1e-6, rtol=1e-6)

    # TODO(synk): sample/get_loglikelihood/calc_kl/entropies/get_value are not
    # part of forward(); they remain plain JAX if needed.
    print("KERNEL_OK")
</pallas_src>

<mosaic_0001>
module attributes {stable_mosaic.version = 11 : i64} {
  func.func @cts_policy_kernel(%arg0: i32, %arg1: memref<37x16xf32, #tpu.memory_space<vmem>>, %arg2: memref<16x64xf32, #tpu.memory_space<vmem>>, %arg3: memref<1x64xf32, #tpu.memory_space<vmem>>, %arg4: memref<64x64xf32, #tpu.memory_space<vmem>>, %arg5: memref<1x64xf32, #tpu.memory_space<vmem>>, %arg6: memref<64x8xf32, #tpu.memory_space<vmem>>, %arg7: memref<1x8xf32, #tpu.memory_space<vmem>>, %arg8: memref<37x8xf32, #tpu.memory_space<vmem>>) attributes {dimension_semantics = [#tpu.dimension_semantics<parallel>], iteration_bounds = array<i64: 1>, scalar_prefetch = 0 : i64, scratch_operands = 0 : i64, tpu.core_type = #tpu.core_type<tc>, window_params = [{transform_indices = @transform_0, window_bounds = array<i64: 37, 16>}, {pipeline_mode = #tpu.pipeline_mode<synchronous>, transform_indices = @transform_1, window_bounds = array<i64: 16, 64>}, {pipeline_mode = #tpu.pipeline_mode<synchronous>, transform_indices = @transform_2, window_bounds = array<i64: 1, 64>}, {pipeline_mode = #tpu.pipeline_mode<synchronous>, transform_indices = @transform_3, window_bounds = array<i64: 64, 64>}, {pipeline_mode = #tpu.pipeline_mode<synchronous>, transform_indices = @transform_4, window_bounds = array<i64: 1, 64>}, {pipeline_mode = #tpu.pipeline_mode<synchronous>, transform_indices = @transform_5, window_bounds = array<i64: 64, 8>}, {pipeline_mode = #tpu.pipeline_mode<synchronous>, transform_indices = @transform_6, window_bounds = array<i64: 1, 8>}, {transform_indices = @transform_7, window_bounds = array<i64: 37, 8>}]} {
    %c0 = arith.constant 0 : index
    %c0_0 = arith.constant 0 : index
    %0 = vector.load %arg1[%c0, %c0_0] : memref<37x16xf32, #tpu.memory_space<vmem>>, vector<37x16xf32>
    %c0_1 = arith.constant 0 : index
    %c0_2 = arith.constant 0 : index
    %1 = vector.load %arg2[%c0_1, %c0_2] : memref<16x64xf32, #tpu.memory_space<vmem>>, vector<16x64xf32>
    %cst = arith.constant dense<0.000000e+00> : vector<37x64xf32>
    %2 = tpu.matmul %0, %1, %cst {dimension_numbers = #tpu.dot_dimension_numbers<[1], [0], [0], [1], [0, 0, 1, 1], [], []>} : vector<37x16xf32>, vector<16x64xf32>, vector<37x64xf32> -> vector<37x64xf32>
    %c0_3 = arith.constant 0 : index
    %c0_4 = arith.constant 0 : index
    %3 = vector.load %arg3[%c0_3, %c0_4] : memref<1x64xf32, #tpu.memory_space<vmem>>, vector<1x64xf32>
    %4 = vector.broadcast %3 : vector<1x64xf32> to vector<37x64xf32>
    %5 = arith.addf %2, %4 : vector<37x64xf32>
    %6 = math.tanh %5 : vector<37x64xf32>
    %c0_5 = arith.constant 0 : index
    %c0_6 = arith.constant 0 : index
    %7 = vector.load %arg4[%c0_5, %c0_6] : memref<64x64xf32, #tpu.memory_space<vmem>>, vector<64x64xf32>
    %cst_7 = arith.constant dense<0.000000e+00> : vector<37x64xf32>
    %8 = tpu.matmul %6, %7, %cst_7 {dimension_numbers = #tpu.dot_dimension_numbers<[1], [0], [0], [1], [0, 0, 1, 1], [], []>} : vector<37x64xf32>, vector<64x64xf32>, vector<37x64xf32> -> vector<37x64xf32>
    %c0_8 = arith.constant 0 : index
    %c0_9 = arith.constant 0 : index
    %9 = vector.load %arg5[%c0_8, %c0_9] : memref<1x64xf32, #tpu.memory_space<vmem>>, vector<1x64xf32>
    %10 = vector.broadcast %9 : vector<1x64xf32> to vector<37x64xf32>
    %11 = arith.addf %8, %10 : vector<37x64xf32>
    %12 = math.tanh %11 : vector<37x64xf32>
    %c0_10 = arith.constant 0 : index
    %c0_11 = arith.constant 0 : index
    %13 = vector.load %arg6[%c0_10, %c0_11] : memref<64x8xf32, #tpu.memory_space<vmem>>, vector<64x8xf32>
    %cst_12 = arith.constant dense<0.000000e+00> : vector<37x8xf32>
    %14 = tpu.matmul %12, %13, %cst_12 {dimension_numbers = #tpu.dot_dimension_numbers<[1], [0], [0], [1], [0, 0, 1, 1], [], []>} : vector<37x64xf32>, vector<64x8xf32>, vector<37x8xf32> -> vector<37x8xf32>
    %c0_13 = arith.constant 0 : index
    %c0_14 = arith.constant 0 : index
    %15 = vector.load %arg7[%c0_13, %c0_14] : memref<1x8xf32, #tpu.memory_space<vmem>>, vector<1x8xf32>
    %16 = vector.broadcast %15 : vector<1x8xf32> to vector<37x8xf32>
    %17 = arith.addf %14, %16 : vector<37x8xf32>
    %c0_15 = arith.constant 0 : index
    %c0_16 = arith.constant 0 : index
    %18 = vector.load %arg8[%c0_15, %c0_16] : memref<37x8xf32, #tpu.memory_space<vmem>>, vector<37x8xf32>
    tpu.vector_store %arg8[%c0_15, %c0_16], %17 {strides = array<i32>} : memref<37x8xf32, #tpu.memory_space<vmem>>, vector<37x8xf32>,
    return
  }
  func.func @transform_0(%arg0: i32) -> (i32, i32) {
    %c0_i32 = arith.constant 0 : i32
    %c0_i32_0 = arith.constant 0 : i32
    return %arg0, %c0_i32 : i32, i32
  }
  func.func @transform_1(%arg0: i32) -> (i32, i32) {
    %c0_i32 = arith.constant 0 : i32
    %c0_i32_0 = arith.constant 0 : i32
    %c0_i32_1 = arith.constant 0 : i32
    return %c0_i32, %c0_i32_0 : i32, i32
  }
  func.func @transform_2(%arg0: i32) -> (i32, i32) {
    %c0_i32 = arith.constant 0 : i32
    %c0_i32_0 = arith.constant 0 : i32
    %c0_i32_1 = arith.constant 0 : i32
    return %c0_i32, %c0_i32_0 : i32, i32
  }
  func.func @transform_3(%arg0: i32) -> (i32, i32) {
    %c0_i32 = arith.constant 0 : i32
    %c0_i32_0 = arith.constant 0 : i32
    %c0_i32_1 = arith.constant 0 : i32
    return %c0_i32, %c0_i32_0 : i32, i32
  }
  func.func @transform_4(%arg0: i32) -> (i32, i32) {
    %c0_i32 = arith.constant 0 : i32
    %c0_i32_0 = arith.constant 0 : i32
    %c0_i32_1 = arith.constant 0 : i32
    return %c0_i32, %c0_i32_0 : i32, i32
  }
  func.func @transform_5(%arg0: i32) -> (i32, i32) {
    %c0_i32 = arith.constant 0 : i32
    %c0_i32_0 = arith.constant 0 : i32
    %c0_i32_1 = arith.constant 0 : i32
    return %c0_i32, %c0_i32_0 : i32, i32
  }
  func.func @transform_6(%arg0: i32) -> (i32, i32) {
    %c0_i32 = arith.constant 0 : i32
    %c0_i32_0 = arith.constant 0 : i32
    %c0_i32_1 = arith.constant 0 : i32
    return %c0_i32, %c0_i32_0 : i32, i32
  }
  func.func @transform_7(%arg0: i32) -> (i32, i32) {
    %c0_i32 = arith.constant 0 : i32
    %c0_i32_0 = arith.constant 0 : i32
    return %arg0, %c0_i32 : i32, i32
  }
}

</mosaic_0001>

<bundles_post_ra>
// kernel: tpu_custom_call.1
= control target key start
LH: loop header
LB: loop body
LE: loop exit
PB: predicated region body
PF: predicated region fallthrough
CT: control target
= control target key end

     0   :  { %v566_v0 = vmov 0.0   ;;  %vm567_vm0 = vmmov 0   ;;  %vm40_vm1 = vcmask 130048   ;;  %vm166_vm2 = vcmask 523264   ;;  %s766_s1 = inlined_call_operand.vmem [shape: f32[16,64], index: 1, kind: input, shape index: {}]   ;;  %s767_s0 = inlined_call_operand.vmem [shape: f32[37,16], index: 0, kind: input, shape index: {}]   ;;  %s768_s3 = inlined_call_operand.vmem [shape: f32[64,64], index: 3, kind: input, shape index: {}]   ;;  %s769_s2 = inlined_call_operand.vmem [shape: f32[1,64], index: 2, kind: input, shape index: {}]   ;;  %s770_s5 = inlined_call_operand.vmem [shape: f32[64,8], index: 5, kind: input, shape index: {}]   ;;  %s771_s4 = inlined_call_operand.vmem [shape: f32[1,64], index: 4, kind: input, shape index: {}]   ;;  %s772_s6 = inlined_call_operand.vmem [shape: f32[1,8], index: 6, kind: input, shape index: {}]   ;;  %s773_s7 = inlined_call_operand.vmem [shape: f32[37,8], index: 7, kind: output, shape index: {}]  }
   0x1   :  { %459 = vmatprep.subr.mxu0 %v566_v0  ;;  %v32_v1 = vld [vmem:[%s766_s1 + $0x8] sm:$0xff]  ;;  %v31_v2 = vld [vmem:[%s766_s1] sm:$0xff]  ;;  %463 = vmatprep.mubr.msk.f32.mxu0 %vm567_vm0, %v566_v0  ;;  %v28_v6 = vld [vmem:[%s767_s0 + $0x10] sm:$0xff]  ;;  %vm397_vm3 = vcmask 64512   ;;  %vm402_vm4 = vcmask 61440  }
   0x2   :  { %460 = vmatpush3.msra.mxu0 %v32_v1  ;;  %v26_v3 = vld [vmem:[%s767_s0] sm:$0xff]  ;;  %540 = vmatprep.subr.mxu1 %v566_v0  ;;  %v27_v5 = vld [vmem:[%s767_s0 + $0x8] sm:$0xff]  ;;  %v29_v7 = vld [vmem:[%s767_s0 + $0x18] sm:$0xff] }
   0x3   :  { %461 = vmatprep.subr.mxu0 %v566_v0  ;;  %542 = vmatpush3.msra.mxu1 %v32_v1  ;;  %v30_v4 = vld [vmem:[%s767_s0 + $0x20] sm:$0x1f]  ;;  %v158_v8 = vld [vmem:[%s768_s3 + $0x38] sm:$0xff]  ;;  %v157_v9 = vld [vmem:[%s768_s3 + $0x30] sm:$0xff] }
   0x4   :  { %462 = vmatpush3.msra.mxu0 %v31_v2  ;;  %541 = vmatprep.subr.mxu1 %v566_v0  ;;  %v156_v10 = vld [vmem:[%s768_s3 + $0x28] sm:$0xff]  ;;  %v155_v11 = vld [vmem:[%s768_s3 + $0x20] sm:$0xff]  ;;  %v154_v12 = vld [vmem:[%s768_s3 + $0x18] sm:$0xff] }
   0x5   :  { %464 = vmatmul.mubr.msk.f32.vlgmr.msra.gmra.mxu0 %vm40_vm1, %v26_v3  ;;  %543 = vmatpush3.msra.mxu1 %v31_v2  ;;  %v153_v13 = vld [vmem:[%s768_s3 + $0x10] sm:$0xff]  ;;  %v152_v14 = vld [vmem:[%s768_s3 + $0x8] sm:$0xff]  ;;  %v151_v15 = vld [vmem:[%s768_s3] sm:$0xff] }
   0x6   :  { %466 = vmatprep.mubr.msk.f32.mxu0 %vm567_vm0, %v566_v0  ;;  %475 = vmatprep.mubr.msk.f32.mxu1 %vm567_vm0, %v566_v0  ;;  %v408_v16 = vld [vmem:[%s769_s2] ss:$0 sm:$0xff]  ;;  %v284_v37 = vld [vmem:[%s770_s5 + $0x38] sm:$0xff]  ;;  %v283_v38 = vld [vmem:[%s770_s5 + $0x30] sm:$0xff] }
   0x7   :  { %476 = vmatmul.mubr.msk.f32.vlgmr.msra.gmra.mxu1 %vm40_vm1, %v30_v4  ;;  %478 = vmatprep.subr.mxu1 %v566_v0  ;;  %v282_v39 = vld [vmem:[%s770_s5 + $0x28] sm:$0xff]  ;;  %v281_v40 = vld [vmem:[%s770_s5 + $0x20] sm:$0xff]  ;;  %v280_v41 = vld [vmem:[%s770_s5 + $0x18] sm:$0xff] }
   0x8   :  { %494 = vmatprep.mubr.msk.f32.mxu1 %vm567_vm0, %v566_v0  ;;  %509 = vmatprep.subr.mxu0 %v566_v0  ;;  %v279_v42 = vld [vmem:[%s770_s5 + $0x10] sm:$0xff]  ;;  %v278_v43 = vld [vmem:[%s770_s5 + $0x8] sm:$0xff]  ;;  %v277_v44 = vld [vmem:[%s770_s5] sm:$0xff] }
   0x9   :  { %467 = vmatmul.mubr.msk.f32.gmra.mxu0 %vm40_vm1, %v27_v5  ;;  %479 = vmatpush3.msra.mxu1 %v158_v8  ;;  %v414_v45 = vld [vmem:[%s771_s4] ss:$0 sm:$0xff] }
   0xa   :  { %469 = vmatprep.mubr.msk.f32.mxu0 %vm567_vm0, %v566_v0  ;;  %480 = vmatprep.subr.mxu1 %v566_v0  ;;  %v420_v3 = vld [vmem:[%s772_s6] ss:$0 sm:$0xff] }
   0xb   :  { %481 = vmatpush3.msra.mxu1 %v157_v9  ;;  %510 = vmatpush3.msra.mxu0 %v284_v37 }
   0xc   :  { %482 = vmatprep.subr.mxu1 %v566_v0  ;;  %511 = vmatprep.subr.mxu0 %v566_v0 }
   0xd   :  { %470 = vmatmul.mubr.msk.f32.gmra.mxu0 %vm40_vm1, %v28_v6  ;;  %483 = vmatpush3.msra.mxu1 %v156_v10 }
   0xe   :  { %472 = vmatprep.mubr.msk.f32.mxu0 %vm567_vm0, %v566_v0  ;;  %484 = vmatprep.subr.mxu1 %v566_v0 }
   0xf   :  { %485 = vmatpush3.msra.mxu1 %v155_v11  ;;  %512 = vmatpush3.msra.mxu0 %v283_v38 }
  0x10   :  { %486 = vmatprep.subr.mxu1 %v566_v0  ;;  %513 = vmatprep.subr.mxu0 %v566_v0 }
  0x11   :  { %473 = vmatmul.mubr.msk.f32.gmra.mxu0 %vm40_vm1, %v29_v7  ;;  %487 = vmatpush3.msra.mxu1 %v154_v12 }
  0x12   :  { %525 = vmatprep.mubr.msk.f32.mxu0 %vm567_vm0, %v566_v0  ;;  %488 = vmatprep.subr.mxu1 %v566_v0 }
  0x13   :  { %489 = vmatpush3.msra.mxu1 %v153_v13  ;;  %514 = vmatpush3.msra.mxu0 %v282_v39 }
  0x14   :  { %490 = vmatprep.subr.mxu1 %v566_v0  ;;  %515 = vmatprep.subr.mxu0 %v566_v0 }
  0x15   :  { %491 = vmatpush3.msra.mxu1 %v152_v14  ;;  %516 = vmatpush3.msra.mxu0 %v281_v40 }
  0x16   :  { %492 = vmatprep.subr.mxu1 %v566_v0  ;;  %517 = vmatprep.subr.mxu0 %v566_v0 }
  0x17   :  { %493 = vmatpush3.msra.mxu1 %v151_v15  ;;  %518 = vmatpush3.msra.mxu0 %v280_v41 }
  0x18   :  { %519 = vmatprep.subr.mxu0 %v566_v0 }
  0x19   :  { %520 = vmatpush3.msra.mxu0 %v279_v42 }
  0x1a   :  { %521 = vmatprep.subr.mxu0 %v566_v0 }
  0x1b   :  { %522 = vmatpush3.msra.mxu0 %v278_v43 }
  0x1c   :  { %523 = vmatprep.subr.mxu0 %v566_v0 }
  0x1d   :  { %524 = vmatpush3.msra.mxu0 %v277_v44 }
  0xc5   :  { %v122_v17 = vpop.f32.mrf.mxu0 }
  0xc6   :  { %v123_v18 = vadd.f32 %v408_v16, %v122_v17 }
  0xc7   :  { %v465_v19 = vpop.f32.mrf.mxu0  ;;  %v142_v20 = vpop.f32.mrf.mxu1 }
  0xc8   :  { %546 = vtanh.f32 %v123_v18  ;;  %v143_v30 = vadd.f32 %v408_v16, %v142_v20 }
  0xc9   :  { %v127_v21 = vpop.f32.mrf.mxu0  ;;  %v477_v22 = vpop.f32.mrf.mxu1 }
  0xca   :  { %v128_v23 = vadd.f32 %v408_v16, %v127_v21 }
  0xcb   :  { %v468_v24 = vpop.f32.mrf.mxu0 }
  0xcc   :  { %548 = vtanh.f32 %v128_v23 }
  0xcd   :  { %v132_v25 = vpop.f32.mrf.mxu0 }
  0xce   :  { %v133_v26 = vadd.f32 %v408_v16, %v132_v25 }
  0xcf   :  { %v471_v27 = vpop.f32.mrf.mxu0 }
  0xd0   :  { %550 = vtanh.f32 %v133_v26 }
  0xd1   :  { %v137_v28 = vpop.f32.mrf.mxu0 }
  0xd2   :  { %v138_v29 = vadd.f32 %v408_v16, %v137_v28 }
  0xd3   :  { %v474_v31 = vpop.f32.mrf.mxu0 }
  0xd4   :  { %552 = vtanh.f32 %v138_v29 }
  0xd5   :  { %v547_v32 = vpop.eup %546  ;;  %554 = vtanh.f32 %v143_v30 }
  0xd6   :  { %495 = vmatmul.mubr.msk.f32.vlgmr.msra.gmra.mxu1 %vm166_vm2, %v547_v32 }
  0xd7   :  { %497 = vmatprep.mubr.msk.f32.mxu1 %vm567_vm0, %v566_v0 }
  0xd9   :  { %v549_v33 = vpop.eup %548 }
  0xda   :  { %498 = vmatmul.mubr.msk.f32.gmra.mxu1 %vm166_vm2, %v549_v33 }
  0xdb   :  { %500 = vmatprep.mubr.msk.f32.mxu1 %vm567_vm0, %v566_v0 }
  0xdd   :  { %v551_v34 = vpop.eup %550 }
  0xde   :  { %501 = vmatmul.mubr.msk.f32.gmra.mxu1 %vm166_vm2, %v551_v34 }
  0xdf   :  { %503 = vmatprep.mubr.msk.f32.mxu1 %vm567_vm0, %v566_v0 }
  0xe1   :  { %v553_v35 = vpop.eup %552 }
  0xe2   :  { %504 = vmatmul.mubr.msk.f32.gmra.mxu1 %vm166_vm2, %v553_v35  ;;  %v555_v36 = vpop.eup %554 }
  0xe3   :  { %506 = vmatprep.mubr.msk.f32.mxu1 %vm567_vm0, %v566_v0 }
  0xe6   :  { %507 = vmatmul.mubr.msk.f32.gmra.mxu1 %vm166_vm2, %v555_v36 }
 0x196   :  { %v248_v46 = vpop.f32.mrf.mxu1 }
 0x197   :  { %v249_v47 = vadd.f32 %v414_v45, %v248_v46 }
 0x198   :  { %v496_v48 = vpop.f32.mrf.mxu1 }
 0x199   :  { %556 = vtanh.f32 %v249_v47 }
 0x19a   :  { %v253_v49 = vpop.f32.mrf.mxu1 }
 0x19b   :  { %v254_v50 = vadd.f32 %v414_v45, %v253_v49 }
 0x19c   :  { %v499_v51 = vpop.f32.mrf.mxu1 }
 0x19d   :  { %558 = vtanh.f32 %v254_v50 }
 0x19e   :  { %v258_v52 = vpop.f32.mrf.mxu1 }
 0x19f   :  { %v259_v53 = vadd.f32 %v414_v45, %v258_v52 }
 0x1a0   :  { %v502_v54 = vpop.f32.mrf.mxu1 }
 0x1a1   :  { %560 = vtanh.f32 %v259_v53 }
 0x1a2   :  { %v263_v55 = vpop.f32.mrf.mxu1 }
 0x1a3   :  { %v264_v56 = vadd.f32 %v414_v45, %v263_v55 }
 0x1a4   :  { %v505_v57 = vpop.f32.mrf.mxu1 }
 0x1a5   :  { %562 = vtanh.f32 %v264_v56 }
 0x1a6   :  { %v557_v58 = vpop.eup %556  ;;  %v268_v59 = vpop.f32.mrf.mxu1 }
 0x1a7   :  { %v269_v60 = vadd.f32 %v414_v45, %v268_v59  ;;  %526 = vmatmul.mubr.msk.f32.vlgmr.msra.gmra.mxu0 %vm166_vm2, %v557_v58 }
 0x1a8   :  { %v508_v61 = vpop.f32.mrf.mxu1  ;;  %528 = vmatprep.mubr.msk.f32.mxu0 %vm567_vm0, %v566_v0 }
 0x1a9   :  { %564 = vtanh.f32 %v269_v60 }
 0x1aa   :  { %v559_v62 = vpop.eup %558 }
 0x1ab   :  { %529 = vmatmul.mubr.msk.f32.gmra.mxu0 %vm166_vm2, %v559_v62 }
 0x1ac   :  { %531 = vmatprep.mubr.msk.f32.mxu0 %vm567_vm0, %v566_v0 }
 0x1ae   :  { %v561_v63 = vpop.eup %560 }
 0x1af   :  { %532 = vmatmul.mubr.msk.f32.gmra.mxu0 %vm166_vm2, %v561_v63 }
 0x1b0   :  { %534 = vmatprep.mubr.msk.f32.mxu0 %vm567_vm0, %v566_v0 }
 0x1b2   :  { %v563_v1 = vpop.eup %562 }
 0x1b3   :  { %535 = vmatmul.mubr.msk.f32.gmra.mxu0 %vm166_vm2, %v563_v1 }
 0x1b4   :  { %537 = vmatprep.mubr.msk.f32.mxu0 %vm567_vm0, %v566_v0 }
 0x1b6   :  { %v565_v2 = vpop.eup %564 }
 0x1b7   :  { %538 = vmatmul.mubr.msk.f32.gmra.mxu0 %vm166_vm2, %v565_v2 }
 0x267   :  { %v373_v4 = vpop.f32.mrf.mxu0 }
 0x268   :  { %v374_v5 = vadd.f32 %v420_v3, %v373_v4 }
 0x269   :  { %v527_v6 = vpop.f32.mrf.mxu0 }
 0x26a   :  { %398 = vst.msk [vmem:[%s773_s7] sm:$0xff] %vm397_vm3, %v374_v5 }
 0x26b   :  { %v378_v7 = vpop.f32.mrf.mxu0 }
 0x26c   :  { %v379_v8 = vadd.f32 %v420_v3, %v378_v7 }
 0x26d   :  { %v530_v9 = vpop.f32.mrf.mxu0 }
 0x26e   :  { %399 = vst.msk [vmem:[%s773_s7 + $0x8] sm:$0xff] %vm397_vm3, %v379_v8 }
 0x26f   :  { %v383_v0 = vpop.f32.mrf.mxu0 }
 0x270   :  { %v384_v10 = vadd.f32 %v420_v3, %v383_v0 }
 0x271   :  { %v533_v11 = vpop.f32.mrf.mxu0 }
 0x272   :  { %400 = vst.msk [vmem:[%s773_s7 + $0x10] sm:$0xff] %vm397_vm3, %v384_v10 }
 0x273   :  { %v388_v12 = vpop.f32.mrf.mxu0 }
 0x274   :  { %v389_v13 = vadd.f32 %v420_v3, %v388_v12 }
 0x275   :  { %v536_v14 = vpop.f32.mrf.mxu0 }
 0x276   :  { %401 = vst.msk [vmem:[%s773_s7 + $0x18] sm:$0xff] %vm397_vm3, %v389_v13 }
 0x277   :  { %v393_v15 = vpop.f32.mrf.mxu0 }
 0x278   :  { %v394_v16 = vadd.f32 %v420_v3, %v393_v15 }
 0x279   :  { %v539_v17 = vpop.f32.mrf.mxu0 }
 0x27a   :  { %403 = vst.msk [vmem:[%s773_s7 + $0x20] sm:$0x1f] %vm402_vm4, %v394_v16 }

</bundles_post_ra>
